<compile_context>
chip_gen: v5e
topology: v5e:2x2
jax: 0.10.0
libtpu: 0.0.40
codegen_flags: <defaults>
</compile_context>

<pallas_src>
import functools
import math

import jax
import jax.numpy as jnp
from jax.experimental import pallas as pl
from jax.experimental.pallas import tpu as pltpu


def _embedding_kernel(ids_ref, table_hbm, o_ref, buf, sem, *, scale, tile_tokens):
    # ids_ref  : SMEM (n_tokens_padded,) int32   (scalar prefetch)
    # table_hbm: HBM  (vocab_size, d_model)      (raw ref, manual DMA gather)
    # o_ref    : VMEM (tile_tokens, d_model)     (auto-pipelined output block)
    # buf      : VMEM (tile_tokens, d_model)     scratch gather tile
    # sem      : DMA semaphores, one per gathered row
    base = pl.program_id(0) * tile_tokens

    # Issue all row-gather DMAs for this tile (overlapped in flight), then wait.
    copies = []
    for t in range(tile_tokens):
        tok = ids_ref[base + t]
        cp = pltpu.make_async_copy(
            table_hbm.at[pl.ds(tok, 1)], buf.at[pl.ds(t, 1)], sem.at[t])
        cp.start()
        copies.append(cp)
    for cp in copies:
        cp.wait()

    # Single wide, lane-dense store over the whole tile.
    o_ref[...] = (buf[...] * scale).astype(o_ref.dtype)


def text_embedding(ids, table, *, tile_tokens: int = 8):
    """Embedding lookup + sqrt(d_model) scaling (TextEmbedding.forward).

    ids:   integer array of any shape (token indices into the table).
    table: (vocab_size, d_model) embedding weights.
    Returns array of shape ids.shape + (d_model,) with table.dtype.
    """
    assert tile_tokens % 8 == 0, "tile_tokens must be a multiple of 8"
    vocab_size, d_model = table.shape
    scale = float(math.sqrt(d_model))

    orig_shape = ids.shape
    n_tokens = 1
    for s in orig_shape:
        n_tokens *= s
    flat_ids = ids.reshape(n_tokens).astype(jnp.int32)

    # Remainder handling: pad the token count up to a multiple of tile_tokens.
    # Pad tokens index row 0 (always valid); their outputs are sliced off below.
    n_pad = pl.cdiv(n_tokens, tile_tokens) * tile_tokens
    if n_pad != n_tokens:
        flat_ids = jnp.pad(flat_ids, (0, n_pad - n_tokens))

    grid = (n_pad // tile_tokens,)

    out = pl.pallas_call(
        functools.partial(_embedding_kernel, scale=scale,
                          tile_tokens=tile_tokens),
        out_shape=jax.ShapeDtypeStruct((n_pad, d_model), table.dtype),
        grid_spec=pltpu.PrefetchScalarGridSpec(
            num_scalar_prefetch=1,                # flat_ids -> SMEM
            grid=grid,
            in_specs=[
                # Table stays in HBM; rows are gathered manually in-kernel.
                pl.BlockSpec(memory_space=pl.ANY),
            ],
            out_specs=pl.BlockSpec((tile_tokens, d_model),
                                   lambda i, ids: (i, 0)),
            scratch_shapes=[
                pltpu.VMEM((tile_tokens, d_model), table.dtype),
                pltpu.SemaphoreType.DMA((tile_tokens,)),
            ],
        ),
        compiler_params=pltpu.CompilerParams(
            dimension_semantics=("parallel",)),
    )(flat_ids, table)

    out = out[:n_tokens]
    return out.reshape(*orig_shape, d_model)


if __name__ == "__main__":
    batch, seq = 2, 8
    vocab_size, d_model = 64, 32

    key = jax.random.PRNGKey(0)
    k_ids, k_tbl = jax.random.split(key)
    ids = jax.random.randint(k_ids, (batch, seq), 0, vocab_size, dtype=jnp.int32)
    table = jax.random.normal(k_tbl, (vocab_size, d_model), dtype=jnp.float32)

    # tile_tokens=8 -> 2 grid steps at this toy shape (keeps both v7x TCs busy);
    # increase tile_tokens for real shapes to further amortize per-step overhead.
    y = text_embedding(ids, table, tile_tokens=8)
    y = jax.block_until_ready(y)

    # Pure-JAX reference of the PyTorch forward.
    ref = table[ids] * math.sqrt(d_model)

    assert y.shape == (batch, seq, d_model) and y.dtype == table.dtype
    assert jnp.allclose(y, ref, atol=1e-6, rtol=1e-6)

    print("KERNEL_OK")
</pallas_src>

<mosaic_0001>
module attributes {stable_mosaic.version = 11 : i64} {
  func.func @_embedding_kernel(%arg0: i32, %arg1: memref<16xi32, #tpu.memory_space<smem>>, %arg2: memref<64x32xf32, #tpu.memory_space<any>>, %arg3: memref<8x32xf32, #tpu.memory_space<vmem>>, %arg4: memref<8x32xf32, #tpu.memory_space<vmem>>, %arg5: memref<8x!tpu.dma_semaphore, #tpu.memory_space<semaphore_mem>>) attributes {dimension_semantics = [#tpu.dimension_semantics<parallel>], iteration_bounds = array<i64: 2>, scalar_prefetch = 1 : i64, scratch_operands = 2 : i64, tpu.core_type = #tpu.core_type<tc>, window_params = [{}, {transform_indices = @transform_1, window_bounds = array<i64: 8, 32>}]} {
    %c8_i32 = arith.constant 8 : i32
    %0 = arith.muli %arg0, %c8_i32 : i32
    %c0_i32 = arith.constant 0 : i32
    %1 = arith.addi %0, %c0_i32 : i32
    %2 = arith.index_cast %1 : i32 to index
    %3 = memref.load %arg1[%2] : memref<16xi32, #tpu.memory_space<smem>>
    %c0_i32_0 = arith.constant 0 : i32
    %c0_i32_1 = arith.constant 0 : i32
    %4 = tpu.memref_slice %arg2[%3, %c0_i32_1] : memref<64x32xf32, #tpu.memory_space<any>> -> memref<1x32xf32, #tpu.memory_space<any>>
    %c0_i32_2 = arith.constant 0 : i32
    %c0_i32_3 = arith.constant 0 : i32
    %5 = tpu.memref_slice %arg4[%c0_i32_2, %c0_i32_3] : memref<8x32xf32, #tpu.memory_space<vmem>> -> memref<1x32xf32, #tpu.memory_space<vmem>>
    %6 = tpu.memref_slice %arg5[%c0_i32_0] : memref<8x!tpu.dma_semaphore, #tpu.memory_space<semaphore_mem>> -> memref<1x!tpu.dma_semaphore, #tpu.memory_space<semaphore_mem>>
    %7 = tpu.memref_squeeze %6 : memref<1x!tpu.dma_semaphore, #tpu.memory_space<semaphore_mem>> -> memref<!tpu.dma_semaphore, #tpu.memory_space<semaphore_mem>>
    tpu.enqueue_dma source(%4 : memref<1x32xf32, #tpu.memory_space<any>>) target(%5 : memref<1x32xf32, #tpu.memory_space<vmem>>) target_semaphore(%7 : memref<!tpu.dma_semaphore, #tpu.memory_space<semaphore_mem>>)
    %c1_i32 = arith.constant 1 : i32
    %8 = arith.addi %0, %c1_i32 : i32
    %9 = arith.index_cast %8 : i32 to index
    %10 = memref.load %arg1[%9] : memref<16xi32, #tpu.memory_space<smem>>
    %c1_i32_4 = arith.constant 1 : i32
    %c0_i32_5 = arith.constant 0 : i32
    %11 = tpu.memref_slice %arg2[%10, %c0_i32_5] : memref<64x32xf32, #tpu.memory_space<any>> -> memref<1x32xf32, #tpu.memory_space<any>>
    %c1_i32_6 = arith.constant 1 : i32
    %c0_i32_7 = arith.constant 0 : i32
    %12 = tpu.memref_slice %arg4[%c1_i32_6, %c0_i32_7] : memref<8x32xf32, #tpu.memory_space<vmem>> -> memref<1x32xf32, #tpu.memory_space<vmem>>
    %13 = tpu.memref_slice %arg5[%c1_i32_4] : memref<8x!tpu.dma_semaphore, #tpu.memory_space<semaphore_mem>> -> memref<1x!tpu.dma_semaphore, #tpu.memory_space<semaphore_mem>>
    %14 = tpu.memref_squeeze %13 : memref<1x!tpu.dma_semaphore, #tpu.memory_space<semaphore_mem>> -> memref<!tpu.dma_semaphore, #tpu.memory_space<semaphore_mem>>
    tpu.enqueue_dma source(%11 : memref<1x32xf32, #tpu.memory_space<any>>) target(%12 : memref<1x32xf32, #tpu.memory_space<vmem>>) target_semaphore(%14 : memref<!tpu.dma_semaphore, #tpu.memory_space<semaphore_mem>>)
    %c2_i32 = arith.constant 2 : i32
    %15 = arith.addi %0, %c2_i32 : i32
    %16 = arith.index_cast %15 : i32 to index
    %17 = memref.load %arg1[%16] : memref<16xi32, #tpu.memory_space<smem>>
    %c2_i32_8 = arith.constant 2 : i32
    %c0_i32_9 = arith.constant 0 : i32
    %18 = tpu.memref_slice %arg2[%17, %c0_i32_9] : memref<64x32xf32, #tpu.memory_space<any>> -> memref<1x32xf32, #tpu.memory_space<any>>
    %c2_i32_10 = arith.constant 2 : i32
    %c0_i32_11 = arith.constant 0 : i32
    %19 = tpu.memref_slice %arg4[%c2_i32_10, %c0_i32_11] : memref<8x32xf32, #tpu.memory_space<vmem>> -> memref<1x32xf32, #tpu.memory_space<vmem>>
    %20 = tpu.memref_slice %arg5[%c2_i32_8] : memref<8x!tpu.dma_semaphore, #tpu.memory_space<semaphore_mem>> -> memref<1x!tpu.dma_semaphore, #tpu.memory_space<semaphore_mem>>
    %21 = tpu.memref_squeeze %20 : memref<1x!tpu.dma_semaphore, #tpu.memory_space<semaphore_mem>> -> memref<!tpu.dma_semaphore, #tpu.memory_space<semaphore_mem>>
    tpu.enqueue_dma source(%18 : memref<1x32xf32, #tpu.memory_space<any>>) target(%19 : memref<1x32xf32, #tpu.memory_space<vmem>>) target_semaphore(%21 : memref<!tpu.dma_semaphore, #tpu.memory_space<semaphore_mem>>)
    %c3_i32 = arith.constant 3 : i32
    %22 = arith.addi %0, %c3_i32 : i32
    %23 = arith.index_cast %22 : i32 to index
    %24 = memref.load %arg1[%23] : memref<16xi32, #tpu.memory_space<smem>>
    %c3_i32_12 = arith.constant 3 : i32
    %c0_i32_13 = arith.constant 0 : i32
    %25 = tpu.memref_slice %arg2[%24, %c0_i32_13] : memref<64x32xf32, #tpu.memory_space<any>> -> memref<1x32xf32, #tpu.memory_space<any>>
    %c3_i32_14 = arith.constant 3 : i32
    %c0_i32_15 = arith.constant 0 : i32
    %26 = tpu.memref_slice %arg4[%c3_i32_14, %c0_i32_15] : memref<8x32xf32, #tpu.memory_space<vmem>> -> memref<1x32xf32, #tpu.memory_space<vmem>>
    %27 = tpu.memref_slice %arg5[%c3_i32_12] : memref<8x!tpu.dma_semaphore, #tpu.memory_space<semaphore_mem>> -> memref<1x!tpu.dma_semaphore, #tpu.memory_space<semaphore_mem>>
    %28 = tpu.memref_squeeze %27 : memref<1x!tpu.dma_semaphore, #tpu.memory_space<semaphore_mem>> -> memref<!tpu.dma_semaphore, #tpu.memory_space<semaphore_mem>>
    tpu.enqueue_dma source(%25 : memref<1x32xf32, #tpu.memory_space<any>>) target(%26 : memref<1x32xf32, #tpu.memory_space<vmem>>) target_semaphore(%28 : memref<!tpu.dma_semaphore, #tpu.memory_space<semaphore_mem>>)
    %c4_i32 = arith.constant 4 : i32
    %29 = arith.addi %0, %c4_i32 : i32
    %30 = arith.index_cast %29 : i32 to index
    %31 = memref.load %arg1[%30] : memref<16xi32, #tpu.memory_space<smem>>
    %c4_i32_16 = arith.constant 4 : i32
    %c0_i32_17 = arith.constant 0 : i32
    %32 = tpu.memref_slice %arg2[%31, %c0_i32_17] : memref<64x32xf32, #tpu.memory_space<any>> -> memref<1x32xf32, #tpu.memory_space<any>>
    %c4_i32_18 = arith.constant 4 : i32
    %c0_i32_19 = arith.constant 0 : i32
    %33 = tpu.memref_slice %arg4[%c4_i32_18, %c0_i32_19] : memref<8x32xf32, #tpu.memory_space<vmem>> -> memref<1x32xf32, #tpu.memory_space<vmem>>
    %34 = tpu.memref_slice %arg5[%c4_i32_16] : memref<8x!tpu.dma_semaphore, #tpu.memory_space<semaphore_mem>> -> memref<1x!tpu.dma_semaphore, #tpu.memory_space<semaphore_mem>>
    %35 = tpu.memref_squeeze %34 : memref<1x!tpu.dma_semaphore, #tpu.memory_space<semaphore_mem>> -> memref<!tpu.dma_semaphore, #tpu.memory_space<semaphore_mem>>
    tpu.enqueue_dma source(%32 : memref<1x32xf32, #tpu.memory_space<any>>) target(%33 : memref<1x32xf32, #tpu.memory_space<vmem>>) target_semaphore(%35 : memref<!tpu.dma_semaphore, #tpu.memory_space<semaphore_mem>>)
    %c5_i32 = arith.constant 5 : i32
    %36 = arith.addi %0, %c5_i32 : i32
    %37 = arith.index_cast %36 : i32 to index
    %38 = memref.load %arg1[%37] : memref<16xi32, #tpu.memory_space<smem>>
    %c5_i32_20 = arith.constant 5 : i32
    %c0_i32_21 = arith.constant 0 : i32
    %39 = tpu.memref_slice %arg2[%38, %c0_i32_21] : memref<64x32xf32, #tpu.memory_space<any>> -> memref<1x32xf32, #tpu.memory_space<any>>
    %c5_i32_22 = arith.constant 5 : i32
    %c0_i32_23 = arith.constant 0 : i32
    %40 = tpu.memref_slice %arg4[%c5_i32_22, %c0_i32_23] : memref<8x32xf32, #tpu.memory_space<vmem>> -> memref<1x32xf32, #tpu.memory_space<vmem>>
    %41 = tpu.memref_slice %arg5[%c5_i32_20] : memref<8x!tpu.dma_semaphore, #tpu.memory_space<semaphore_mem>> -> memref<1x!tpu.dma_semaphore, #tpu.memory_space<semaphore_mem>>
    %42 = tpu.memref_squeeze %41 : memref<1x!tpu.dma_semaphore, #tpu.memory_space<semaphore_mem>> -> memref<!tpu.dma_semaphore, #tpu.memory_space<semaphore_mem>>
    tpu.enqueue_dma source(%39 : memref<1x32xf32, #tpu.memory_space<any>>) target(%40 : memref<1x32xf32, #tpu.memory_space<vmem>>) target_semaphore(%42 : memref<!tpu.dma_semaphore, #tpu.memory_space<semaphore_mem>>)
    %c6_i32 = arith.constant 6 : i32
    %43 = arith.addi %0, %c6_i32 : i32
    %44 = arith.index_cast %43 : i32 to index
    %45 = memref.load %arg1[%44] : memref<16xi32, #tpu.memory_space<smem>>
    %c6_i32_24 = arith.constant 6 : i32
    %c0_i32_25 = arith.constant 0 : i32
    %46 = tpu.memref_slice %arg2[%45, %c0_i32_25] : memref<64x32xf32, #tpu.memory_space<any>> -> memref<1x32xf32, #tpu.memory_space<any>>
    %c6_i32_26 = arith.constant 6 : i32
    %c0_i32_27 = arith.constant 0 : i32
    %47 = tpu.memref_slice %arg4[%c6_i32_26, %c0_i32_27] : memref<8x32xf32, #tpu.memory_space<vmem>> -> memref<1x32xf32, #tpu.memory_space<vmem>>
    %48 = tpu.memref_slice %arg5[%c6_i32_24] : memref<8x!tpu.dma_semaphore, #tpu.memory_space<semaphore_mem>> -> memref<1x!tpu.dma_semaphore, #tpu.memory_space<semaphore_mem>>
    %49 = tpu.memref_squeeze %48 : memref<1x!tpu.dma_semaphore, #tpu.memory_space<semaphore_mem>> -> memref<!tpu.dma_semaphore, #tpu.memory_space<semaphore_mem>>
    tpu.enqueue_dma source(%46 : memref<1x32xf32, #tpu.memory_space<any>>) target(%47 : memref<1x32xf32, #tpu.memory_space<vmem>>) target_semaphore(%49 : memref<!tpu.dma_semaphore, #tpu.memory_space<semaphore_mem>>)
    %c7_i32 = arith.constant 7 : i32
    %50 = arith.addi %0, %c7_i32 : i32
    %51 = arith.index_cast %50 : i32 to index
    %52 = memref.load %arg1[%51] : memref<16xi32, #tpu.memory_space<smem>>
    %c7_i32_28 = arith.constant 7 : i32
    %c0_i32_29 = arith.constant 0 : i32
    %53 = tpu.memref_slice %arg2[%52, %c0_i32_29] : memref<64x32xf32, #tpu.memory_space<any>> -> memref<1x32xf32, #tpu.memory_space<any>>
    %c7_i32_30 = arith.constant 7 : i32
    %c0_i32_31 = arith.constant 0 : i32
    %54 = tpu.memref_slice %arg4[%c7_i32_30, %c0_i32_31] : memref<8x32xf32, #tpu.memory_space<vmem>> -> memref<1x32xf32, #tpu.memory_space<vmem>>
    %55 = tpu.memref_slice %arg5[%c7_i32_28] : memref<8x!tpu.dma_semaphore, #tpu.memory_space<semaphore_mem>> -> memref<1x!tpu.dma_semaphore, #tpu.memory_space<semaphore_mem>>
    %56 = tpu.memref_squeeze %55 : memref<1x!tpu.dma_semaphore, #tpu.memory_space<semaphore_mem>> -> memref<!tpu.dma_semaphore, #tpu.memory_space<semaphore_mem>>
    tpu.enqueue_dma source(%53 : memref<1x32xf32, #tpu.memory_space<any>>) target(%54 : memref<1x32xf32, #tpu.memory_space<vmem>>) target_semaphore(%56 : memref<!tpu.dma_semaphore, #tpu.memory_space<semaphore_mem>>)
    %c0_i32_32 = arith.constant 0 : i32
    %c0_i32_33 = arith.constant 0 : i32
    %57 = tpu.memref_slice %arg2[%3, %c0_i32_33] : memref<64x32xf32, #tpu.memory_space<any>> -> memref<1x32xf32, #tpu.memory_space<any>>
    %c0_i32_34 = arith.constant 0 : i32
    %c0_i32_35 = arith.constant 0 : i32
    %58 = tpu.memref_slice %arg4[%c0_i32_34, %c0_i32_35] : memref<8x32xf32, #tpu.memory_space<vmem>> -> memref<1x32xf32, #tpu.memory_space<vmem>>
    %59 = tpu.memref_slice %arg5[%c0_i32_32] : memref<8x!tpu.dma_semaphore, #tpu.memory_space<semaphore_mem>> -> memref<1x!tpu.dma_semaphore, #tpu.memory_space<semaphore_mem>>
    %60 = tpu.memref_squeeze %59 : memref<1x!tpu.dma_semaphore, #tpu.memory_space<semaphore_mem>> -> memref<!tpu.dma_semaphore, #tpu.memory_space<semaphore_mem>>
    tpu.wait_dma2 semaphore(%60 : memref<!tpu.dma_semaphore, #tpu.memory_space<semaphore_mem>>) src(%57 : memref<1x32xf32, #tpu.memory_space<any>>) dst(%58 : memref<1x32xf32, #tpu.memory_space<vmem>>)
    %c1_i32_36 = arith.constant 1 : i32
    %c0_i32_37 = arith.constant 0 : i32
    %61 = tpu.memref_slice %arg2[%10, %c0_i32_37] : memref<64x32xf32, #tpu.memory_space<any>> -> memref<1x32xf32, #tpu.memory_space<any>>
    %c1_i32_38 = arith.constant 1 : i32
    %c0_i32_39 = arith.constant 0 : i32
    %62 = tpu.memref_slice %arg4[%c1_i32_38, %c0_i32_39] : memref<8x32xf32, #tpu.memory_space<vmem>> -> memref<1x32xf32, #tpu.memory_space<vmem>>
    %63 = tpu.memref_slice %arg5[%c1_i32_36] : memref<8x!tpu.dma_semaphore, #tpu.memory_space<semaphore_mem>> -> memref<1x!tpu.dma_semaphore, #tpu.memory_space<semaphore_mem>>
    %64 = tpu.memref_squeeze %63 : memref<1x!tpu.dma_semaphore, #tpu.memory_space<semaphore_mem>> -> memref<!tpu.dma_semaphore, #tpu.memory_space<semaphore_mem>>
    tpu.wait_dma2 semaphore(%64 : memref<!tpu.dma_semaphore, #tpu.memory_space<semaphore_mem>>) src(%61 : memref<1x32xf32, #tpu.memory_space<any>>) dst(%62 : memref<1x32xf32, #tpu.memory_space<vmem>>)
    %c2_i32_40 = arith.constant 2 : i32
    %c0_i32_41 = arith.constant 0 : i32
    %65 = tpu.memref_slice %arg2[%17, %c0_i32_41] : memref<64x32xf32, #tpu.memory_space<any>> -> memref<1x32xf32, #tpu.memory_space<any>>
    %c2_i32_42 = arith.constant 2 : i32
    %c0_i32_43 = arith.constant 0 : i32
    %66 = tpu.memref_slice %arg4[%c2_i32_42, %c0_i32_43] : memref<8x32xf32, #tpu.memory_space<vmem>> -> memref<1x32xf32, #tpu.memory_space<vmem>>
    %67 = tpu.memref_slice %arg5[%c2_i32_40] : memref<8x!tpu.dma_semaphore, #tpu.memory_space<semaphore_mem>> -> memref<1x!tpu.dma_semaphore, #tpu.memory_space<semaphore_mem>>
    %68 = tpu.memref_squeeze %67 : memref<1x!tpu.dma_semaphore, #tpu.memory_space<semaphore_mem>> -> memref<!tpu.dma_semaphore, #tpu.memory_space<semaphore_mem>>
    tpu.wait_dma2 semaphore(%68 : memref<!tpu.dma_semaphore, #tpu.memory_space<semaphore_mem>>) src(%65 : memref<1x32xf32, #tpu.memory_space<any>>) dst(%66 : memref<1x32xf32, #tpu.memory_space<vmem>>)
    %c3_i32_44 = arith.constant 3 : i32
    %c0_i32_45 = arith.constant 0 : i32
    %69 = tpu.memref_slice %arg2[%24, %c0_i32_45] : memref<64x32xf32, #tpu.memory_space<any>> -> memref<1x32xf32, #tpu.memory_space<any>>
    %c3_i32_46 = arith.constant 3 : i32
    %c0_i32_47 = arith.constant 0 : i32
    %70 = tpu.memref_slice %arg4[%c3_i32_46, %c0_i32_47] : memref<8x32xf32, #tpu.memory_space<vmem>> -> memref<1x32xf32, #tpu.memory_space<vmem>>
    %71 = tpu.memref_slice %arg5[%c3_i32_44] : memref<8x!tpu.dma_semaphore, #tpu.memory_space<semaphore_mem>> -> memref<1x!tpu.dma_semaphore, #tpu.memory_space<semaphore_mem>>
    %72 = tpu.memref_squeeze %71 : memref<1x!tpu.dma_semaphore, #tpu.memory_space<semaphore_mem>> -> memref<!tpu.dma_semaphore, #tpu.memory_space<semaphore_mem>>
    tpu.wait_dma2 semaphore(%72 : memref<!tpu.dma_semaphore, #tpu.memory_space<semaphore_mem>>) src(%69 : memref<1x32xf32, #tpu.memory_space<any>>) dst(%70 : memref<1x32xf32, #tpu.memory_space<vmem>>)
    %c4_i32_48 = arith.constant 4 : i32
    %c0_i32_49 = arith.constant 0 : i32
    %73 = tpu.memref_slice %arg2[%31, %c0_i32_49] : memref<64x32xf32, #tpu.memory_space<any>> -> memref<1x32xf32, #tpu.memory_space<any>>
    %c4_i32_50 = arith.constant 4 : i32
    %c0_i32_51 = arith.constant 0 : i32
    %74 = tpu.memref_slice %arg4[%c4_i32_50, %c0_i32_51] : memref<8x32xf32, #tpu.memory_space<vmem>> -> memref<1x32xf32, #tpu.memory_space<vmem>>
    %75 = tpu.memref_slice %arg5[%c4_i32_48] : memref<8x!tpu.dma_semaphore, #tpu.memory_space<semaphore_mem>> -> memref<1x!tpu.dma_semaphore, #tpu.memory_space<semaphore_mem>>
    %76 = tpu.memref_squeeze %75 : memref<1x!tpu.dma_semaphore, #tpu.memory_space<semaphore_mem>> -> memref<!tpu.dma_semaphore, #tpu.memory_space<semaphore_mem>>
    tpu.wait_dma2 semaphore(%76 : memref<!tpu.dma_semaphore, #tpu.memory_space<semaphore_mem>>) src(%73 : memref<1x32xf32, #tpu.memory_space<any>>) dst(%74 : memref<1x32xf32, #tpu.memory_space<vmem>>)
    %c5_i32_52 = arith.constant 5 : i32
    %c0_i32_53 = arith.constant 0 : i32
    %77 = tpu.memref_slice %arg2[%38, %c0_i32_53] : memref<64x32xf32, #tpu.memory_space<any>> -> memref<1x32xf32, #tpu.memory_space<any>>
    %c5_i32_54 = arith.constant 5 : i32
    %c0_i32_55 = arith.constant 0 : i32
    %78 = tpu.memref_slice %arg4[%c5_i32_54, %c0_i32_55] : memref<8x32xf32, #tpu.memory_space<vmem>> -> memref<1x32xf32, #tpu.memory_space<vmem>>
    %79 = tpu.memref_slice %arg5[%c5_i32_52] : memref<8x!tpu.dma_semaphore, #tpu.memory_space<semaphore_mem>> -> memref<1x!tpu.dma_semaphore, #tpu.memory_space<semaphore_mem>>
    %80 = tpu.memref_squeeze %79 : memref<1x!tpu.dma_semaphore, #tpu.memory_space<semaphore_mem>> -> memref<!tpu.dma_semaphore, #tpu.memory_space<semaphore_mem>>
    tpu.wait_dma2 semaphore(%80 : memref<!tpu.dma_semaphore, #tpu.memory_space<semaphore_mem>>) src(%77 : memref<1x32xf32, #tpu.memory_space<any>>) dst(%78 : memref<1x32xf32, #tpu.memory_space<vmem>>)
    %c6_i32_56 = arith.constant 6 : i32
    %c0_i32_57 = arith.constant 0 : i32
    %81 = tpu.memref_slice %arg2[%45, %c0_i32_57] : memref<64x32xf32, #tpu.memory_space<any>> -> memref<1x32xf32, #tpu.memory_space<any>>
    %c6_i32_58 = arith.constant 6 : i32
    %c0_i32_59 = arith.constant 0 : i32
    %82 = tpu.memref_slice %arg4[%c6_i32_58, %c0_i32_59] : memref<8x32xf32, #tpu.memory_space<vmem>> -> memref<1x32xf32, #tpu.memory_space<vmem>>
    %83 = tpu.memref_slice %arg5[%c6_i32_56] : memref<8x!tpu.dma_semaphore, #tpu.memory_space<semaphore_mem>> -> memref<1x!tpu.dma_semaphore, #tpu.memory_space<semaphore_mem>>
    %84 = tpu.memref_squeeze %83 : memref<1x!tpu.dma_semaphore, #tpu.memory_space<semaphore_mem>> -> memref<!tpu.dma_semaphore, #tpu.memory_space<semaphore_mem>>
    tpu.wait_dma2 semaphore(%84 : memref<!tpu.dma_semaphore, #tpu.memory_space<semaphore_mem>>) src(%81 : memref<1x32xf32, #tpu.memory_space<any>>) dst(%82 : memref<1x32xf32, #tpu.memory_space<vmem>>)
    %c7_i32_60 = arith.constant 7 : i32
    %c0_i32_61 = arith.constant 0 : i32
    %85 = tpu.memref_slice %arg2[%52, %c0_i32_61] : memref<64x32xf32, #tpu.memory_space<any>> -> memref<1x32xf32, #tpu.memory_space<any>>
    %c7_i32_62 = arith.constant 7 : i32
    %c0_i32_63 = arith.constant 0 : i32
    %86 = tpu.memref_slice %arg4[%c7_i32_62, %c0_i32_63] : memref<8x32xf32, #tpu.memory_space<vmem>> -> memref<1x32xf32, #tpu.memory_space<vmem>>
    %87 = tpu.memref_slice %arg5[%c7_i32_60] : memref<8x!tpu.dma_semaphore, #tpu.memory_space<semaphore_mem>> -> memref<1x!tpu.dma_semaphore, #tpu.memory_space<semaphore_mem>>
    %88 = tpu.memref_squeeze %87 : memref<1x!tpu.dma_semaphore, #tpu.memory_space<semaphore_mem>> -> memref<!tpu.dma_semaphore, #tpu.memory_space<semaphore_mem>>
    tpu.wait_dma2 semaphore(%88 : memref<!tpu.dma_semaphore, #tpu.memory_space<semaphore_mem>>) src(%85 : memref<1x32xf32, #tpu.memory_space<any>>) dst(%86 : memref<1x32xf32, #tpu.memory_space<vmem>>)
    %c0 = arith.constant 0 : index
    %c0_64 = arith.constant 0 : index
    %89 = vector.load %arg4[%c0, %c0_64] : memref<8x32xf32, #tpu.memory_space<vmem>>, vector<8x32xf32>
    %cst = arith.constant 5.65685415 : f32
    %90 = vector.broadcast %cst : f32 to vector<8x32xf32>
    %91 = arith.mulf %89, %90 : vector<8x32xf32>
    %c0_65 = arith.constant 0 : index
    %c0_66 = arith.constant 0 : index
    %92 = vector.load %arg3[%c0_65, %c0_66] : memref<8x32xf32, #tpu.memory_space<vmem>>, vector<8x32xf32>
    tpu.vector_store %arg3[%c0_65, %c0_66], %91 {strides = array<i32>} : memref<8x32xf32, #tpu.memory_space<vmem>>, vector<8x32xf32>,
    return
  }
  func.func @transform_1(%arg0: i32, %arg1: memref<16xi32, #tpu.memory_space<smem>>) -> (i32, i32) {
    %c0_i32 = arith.constant 0 : i32
    %c0_i32_0 = arith.constant 0 : i32
    return %arg0, %c0_i32 : i32, i32
  }
}

</mosaic_0001>

<bundles_post_ra>
// kernel: tpu_custom_call.1
= control target key start
LH: loop header
LB: loop body
LE: loop exit
PB: predicated region body
PF: predicated region fallthrough
CT: control target
= control target key end

     0   :  { %s676_s12 = smov [#allocation5]   ;;  %s807_s0 = inlined_call_operand.vmem [shape: s32[16], index: 0, kind: input, shape index: {}]   ;;  %s808_s1 = inlined_call_operand.vmem [shape: f32[64,32], index: 1, kind: input, shape index: {}]   ;;  %s809_s2 = inlined_call_operand.hbm [shape: f32[16,32], index: 2, kind: output, shape index: {}]  }
   0x1   :  { %s8_s11 = sshll.u32 %s807_s0, 4  ;;  %s9_s11 = int_to_ptr.vmem [resolvable:$true] %s8_s11 }
   0x2   :  { %11 = dma.vmem_to_smem %s9_s11, 16, %s676_s12, [#allocation4] }
   0x3   :  { %642 = dma.done.wait [#allocation4], 16 }
   0x4   :  { %643 = vsyncadd [#allocation4], 4294967280 }
   0x5   :  { %14 = sfence }
   0x6   :  { %15 = vsyncpa [#allocation7], 0 }
   0x7   :  { %17 = vsyncpa [#allocation7 + $0x1], 0  ;;  %s695_s13 = smov 0   ;;  %s697_s14 = smov 0  }
   0x8   :  { %s699_s15 = smov 0  }
   0x9 LB: > { %s541_s0 = sadd.s32 4294967295, %s674_s15   ;;  %s712_s16 = sadd.s32 1, %s674_s15   ;;  %s674_s15 = sphi %s699_s15, %s814_s15   ;;  %s670_s14 = sphi %s697_s14, %s813_s14   ;;  %s666_s13 = sphi %s695_s13, %s812_s13  }
   0xa   : > { %s26_s17 = ssub.s32 %s674_s15, %s712_s16  ;;  %s29_s18 = sadd.s32 1, %s670_s14 }
   0xb   : > { %p27_p0 = scmp.eq.s32.totalorder %s26_s17, 0  ;;  %p542_p1 = scmp.ne.s32.totalorder %s26_s17, 0 }
   0xc   : > { %p33_p2 = scmp.eq.s32.totalorder %s674_s15, 1  ;;  %p38_p3 = scmp.ne.s32.totalorder %s670_s14, %s666_s13 }
   0xd   : > { %s721_s19 = scalar_select %p27_p0, %s670_s14, %s29_s18  }
   0xe   : > { %p723_p4 = por %p542_p1, %p33_p2  ;;  %p39_p5 = scmp.eq.s32.totalorder %s541_s0, 1 }
   0xf   : > { %p543_p7 = scmp.ge.s32.totalorder %s674_s15, 2 }
  0x10   : > { %p727_p6 = por %p39_p5, %p38_p3  ;;  %s53_s22 = sand.u32 (!%p543_p7), 1, %s670_s14  }
  0x11   : > { %48 = sbr.rel (%p543_p7) target bundleno = 127 (0x7f), region = 12  ;;  %s734_s23 = sshll.u32 (!%p543_p7), %s674_s15, 3 }
  0x12   : > { %s738_s24 = sshll.u32 (!%p543_p7), %s53_s22, 3  ;;  %s57_s25 = sld [smem:[#allocation5 + %s734_s23]] (!%p543_p7) }
  0x13   : > { %s55_s29 = scalar_lea.vmem (!%p543_p7), [#allocation6], %s738_s24 }
  0x18   : > { %s58_s28 = scalar_lea.vmem %s808_s1, %s57_s25 }
  0x19   : > { %v73_v0 = vld [vmem:[%s58_s28] sm:$0x1] }
  0x1a   : > { %74 = vst [vmem:[#allocation2] sm:$0x1] %v73_v0 }
  0x1b   : > { %92 = vsyncadd [#allocation3], 16  ;;  %s93_s30 = sadd.s32 1, %s734_s23 }
  0x1c   : > { %s94_s3 = sld [smem:[#allocation5 + %s93_s30]] }
  0x22   : > { %s95_s6 = scalar_lea.vmem %s808_s1, %s94_s3 }
  0x23   : > { %v112_v1 = vld [vmem:[%s95_s6] sm:$0x1] }
  0x24   : > { %113 = vst [vmem:[#allocation2 + $0x1] sm:$0x1] %v112_v1 }
  0x25   : > { %131 = vsyncadd [#allocation3 + $0x1], 16  ;;  %s132_s7 = sadd.s32 2, %s734_s23 }
  0x26   : > { %s133_s8 = sld [smem:[#allocation5 + %s132_s7]] }
  0x2c   : > { %s134_s11 = scalar_lea.vmem %s808_s1, %s133_s8 }
  0x2d   : > { %v151_v2 = vld [vmem:[%s134_s11] sm:$0x1] }
  0x2e   : > { %152 = vst [vmem:[#allocation2 + $0x2] sm:$0x1] %v151_v2 }
  0x2f   : > { %170 = vsyncadd [#allocation3 + $0x2], 16  ;;  %s171_s12 = sadd.s32 3, %s734_s23 }
  0x30   : > { %s172_s0 = sld [smem:[#allocation5 + %s171_s12]] }
  0x36   : > { %s173_s25 = scalar_lea.vmem %s808_s1, %s172_s0 }
  0x37   : > { %v190_v3 = vld [vmem:[%s173_s25] sm:$0x1] }
  0x38   : > { %191 = vst [vmem:[#allocation2 + $0x3] sm:$0x1] %v190_v3 }
  0x39   : > { %209 = vsyncadd [#allocation3 + $0x3], 16  ;;  %s210_s26 = sadd.s32 4, %s734_s23 }
  0x3a   : > { %s211_s27 = sld [smem:[#allocation5 + %s210_s26]] }
  0x40   : > { %s212_s3 = scalar_lea.vmem %s808_s1, %s211_s27 }
  0x41   : > { %v229_v4 = vld [vmem:[%s212_s3] sm:$0x1] }
  0x42   : > { %230 = vst [vmem:[#allocation2 + $0x4] sm:$0x1] %v229_v4 }
  0x43   : > { %248 = vsyncadd [#allocation3 + $0x4], 16  ;;  %s249_s4 = sadd.s32 5, %s734_s23 }
  0x44   : > { %s250_s5 = sld [smem:[#allocation5 + %s249_s4]] }
  0x4a   : > { %s251_s8 = scalar_lea.vmem %s808_s1, %s250_s5 }
  0x4b   : > { %v268_v5 = vld [vmem:[%s251_s8] sm:$0x1] }
  0x4c   : > { %269 = vst [vmem:[#allocation2 + $0x5] sm:$0x1] %v268_v5 }
  0x4d   : > { %287 = vsyncadd [#allocation3 + $0x5], 16  ;;  %s288_s9 = sadd.s32 6, %s734_s23 }
  0x4e   : > { %s289_s10 = sld [smem:[#allocation5 + %s288_s9]] }
  0x54   : > { %s290_s0 = scalar_lea.vmem %s808_s1, %s289_s10 }
  0x55   : > { %v307_v6 = vld [vmem:[%s290_s0] sm:$0x1] }
  0x56   : > { %308 = vst [vmem:[#allocation2 + $0x6] sm:$0x1] %v307_v6 }
  0x57   : > { %326 = vsyncadd [#allocation3 + $0x6], 16  ;;  %s327_s17 = sadd.s32 7, %s734_s23 }
  0x58   : > { %s328_s18 = sld [smem:[#allocation5 + %s327_s17]] }
  0x5e   : > { %s329_s27 = scalar_lea.vmem %s808_s1, %s328_s18 }
  0x5f   : > { %v346_v7 = vld [vmem:[%s329_s27] sm:$0x1] }
  0x60   : > { %347 = vst [vmem:[#allocation2 + $0x7] sm:$0x1] %v346_v7 }
  0x61   : > { %365 = vsyncadd [#allocation3 + $0x7], 16 }
  0x62   : > { %644 = dma.done.wait [#allocation3], 16 }
  0x63   : > { %645 = vsyncadd [#allocation3], 4294967280 }
  0x64   : > { %646 = dma.done.wait [#allocation3 + $0x1], 16 }
  0x65   : > { %647 = vsyncadd [#allocation3 + $0x1], 4294967280 }
  0x66   : > { %648 = dma.done.wait [#allocation3 + $0x2], 16 }
  0x67   : > { %649 = vsyncadd [#allocation3 + $0x2], 4294967280 }
  0x68   : > { %650 = dma.done.wait [#allocation3 + $0x3], 16 }
  0x69   : > { %651 = vsyncadd [#allocation3 + $0x3], 4294967280 }
  0x6a   : > { %652 = dma.done.wait [#allocation3 + $0x4], 16 }
  0x6b   : > { %653 = vsyncadd [#allocation3 + $0x4], 4294967280 }
  0x6c   : > { %654 = dma.done.wait [#allocation3 + $0x5], 16 }
  0x6d   : > { %655 = vsyncadd [#allocation3 + $0x5], 4294967280 }
  0x6e   : > { %656 = dma.done.wait [#allocation3 + $0x6], 16 }
  0x6f   : > { %657 = vsyncadd [#allocation3 + $0x6], 4294967280 }
  0x70   : > { %658 = dma.done.wait [#allocation3 + $0x7], 16 }
  0x71   : > { %659 = vsyncadd [#allocation3 + $0x7], 4294967280  ;;  %s398_s3 = scalar_lea.hbm %s809_s2, %s734_s23  ;;  %s400_s4 = sshll.u32 %s55_s29, 4  ;;  %v383_v8 = vld [vmem:[#allocation2] sm:$0xff]  ;;  %vm385_vm0 = vcmask 261120   ;;  %s401_s4 = int_to_ptr.vmem [resolvable:$true] %s400_s4 }
  0x72   : > { %s402_s5 = sshll.u32 %s398_s3, 4  ;;  %v384_v9 = vmul.f32 5.656854, %v383_v8  ;;  %s388_s6 = scalar_lea.sflag [#allocation7], %s53_s22  ;;  %s403_s5 = int_to_ptr.hbm [resolvable:$true] %s402_s5 }
  0x73   : > { %s616_s7 = sshra.s32 %s403_s5, 4  ;;  %s622_s10 = scalar_lea.hbm %s809_s2, 16  ;;  %s617_s7 = int_to_ptr.hbm [resolvable:$true] %s616_s7 }
  0x74   : > { %386 = vst.msk [vmem:[%s55_s29] sm:$0xff] %vm385_vm0, %v384_v9  ;;  %s618_s8 = scalar_lea.hbm %s617_s7, 8  ;;  %p623_p11 = scmp.lt.s32.totalorder %s617_s7, %s809_s2 }
  0x75   : > { %p619_p8 = scmp.ne.s32.totalorder %s617_s7, %s618_s8  ;;  %p624_p12 = scmp.lt.s32.totalorder %s622_s10, %s618_s8 }
  0x77   : > { %p620_p9 = pnand %p619_p8, %p723_p4  ;;  %p625_p13 = por %p624_p12, %p623_p11 }
  0x79   : > { %p621_p10 = pneg %p620_p9 }
  0x7b   : > { %p626_p0 = pnand %p625_p13, %p621_p10 }
  0x7d   : > { %629 = shalt.err (!%p626_p0)
}
  0x7e   : > { %558 = dma.vmem_to_hbm [thread:$0]  (%p723_p4), %s401_s4, 128, %s403_s5, %s388_s6  }
  0x7f PF: > { %p564_p1 = scmp.ge.s32.totalorder %s674_s15, 1  ;;  %s414_s22 = sand.u32 1, %s666_s13  }
  0x80   : > { %s415_s24 = scalar_lea.sflag [#allocation7], %s414_s22 }
  0x81   : > { %p561_p2 = pnand %p564_p1, %p727_p6 }
  0x83   : > { %p562_p3 = pneg %p561_p2 }
  0x85   : > { %661 = dma.done.wait (%p562_p3), %s415_s24, 128  }
  0x86   : > { %663 = vsyncadd (%p562_p3), %s415_s24, 4294967168  ;;  %p20_p5 = scmp.ge.s32.totalorder %s712_s16, 3   ;;  %s812_s13 = smov %s670_s14 }
  0x87   : > { %s813_s14 = smov %s721_s19  ;;  %s814_s15 = smov %s712_s16 }
  0x88   :  { %22 = sbr.rel (!%p20_p5) target bundleno = 9 (0x9), region = 345 }
  0x8d   :  { %421 = vsyncpa [#allocation7], 1 }
  0x8e   :  { %423 = vsyncpa [#allocation7 + $0x1], 1 }
  0x8f   :  { %424 = vsyncmov [#allocation3] }
  0x92   :  { %s425_s15 = vpop.sfrf %424 }
  0x93   :  { %p550_p4 = scmp.ne.s32.totalorder %s425_s15, 0 }
  0x95   :  { %429 = shalt.err (%p550_p4)  }
  0x96   :  { %431 = vsyncmov [#allocation3 + $0x1] }
  0x99   :  { %s432_s20 = vpop.sfrf %431 }
  0x9a   :  { %p551_p6 = scmp.ne.s32.totalorder %s432_s20, 0 }
  0x9c   :  { %436 = shalt.err (%p551_p6)  }
  0x9d   :  { %438 = vsyncmov [#allocation3 + $0x2] }
  0xa0   :  { %s439_s21 = vpop.sfrf %438 }
  0xa1   :  { %p552_p7 = scmp.ne.s32.totalorder %s439_s21, 0 }
  0xa3   :  { %443 = shalt.err (%p552_p7)  }
  0xa4   :  { %445 = vsyncmov [#allocation3 + $0x3] }
  0xa7   :  { %s446_s29 = vpop.sfrf %445 }
  0xa8   :  { %p553_p8 = scmp.ne.s32.totalorder %s446_s29, 0 }
  0xaa   :  { %450 = shalt.err (%p553_p8)  }
  0xab   :  { %452 = vsyncmov [#allocation3 + $0x4] }
  0xae   :  { %s453_s16 = vpop.sfrf %452 }
  0xaf   :  { %p554_p9 = scmp.ne.s32.totalorder %s453_s16, 0 }
  0xb1   :  { %457 = shalt.err (%p554_p9)  }
  0xb2   :  { %459 = vsyncmov [#allocation3 + $0x5] }
  0xb5   :  { %s460_s1 = vpop.sfrf %459 }
  0xb6   :  { %p555_p10 = scmp.ne.s32.totalorder %s460_s1, 0 }
  0xb8   :  { %464 = shalt.err (%p555_p10)  }
  0xb9   :  { %466 = vsyncmov [#allocation3 + $0x6] }
  0xbc   :  { %s467_s2 = vpop.sfrf %466 }
  0xbd   :  { %p556_p11 = scmp.ne.s32.totalorder %s467_s2, 0 }
  0xbf   :  { %471 = shalt.err (%p556_p11)  }
  0xc0   :  { %473 = vsyncmov [#allocation3 + $0x7] }
  0xc3   :  { %s474_s13 = vpop.sfrf %473 }
  0xc4   :  { %p557_p12 = scmp.ne.s32.totalorder %s474_s13, 0 }
  0xc6   :  { %478 = shalt.err (%p557_p12)  }

</bundles_post_ra>
